<compile_context>
chip_gen: v7x
topology: tpu7x:2x2x1
jax: 0.10.0
libtpu: 0.0.40
codegen_flags: <defaults>
</compile_context>

<pallas_src>
import jax
import jax.numpy as jnp
from jax.experimental import pallas as pl
from jax.experimental.pallas import tpu as pltpu

INPUT_SIZE = 115          # hard-coded in the PyTorch module
HIDDEN = 32               # num_hiddens
GATES = 4 * HIDDEN        # 128 -> exactly one vreg of lanes / one MXU tile wide
NUM_CLASSES = 10          # num_classes
BATCH = 2                 # demo batch (module spec)
TILE_B = 8                # batch tile = full sublane count


def _round_up(n, m):
    return (n + m - 1) // m * m


# Row layout of the packed weight slab; every matrix segment is a full 128-row tile.
ROW_W0 = 0            # [0,   128)  W_ih_l0^T  (115 valid rows, rest zero), cols [i|o|g|o]
ROW_W1 = 128          # [128, 256)  W_ih_l1^T  (32 valid rows,  rest zero), cols [i|o|g|o]
ROW_WFC = 256         # [256, 384)  W_fc^T     (32 valid rows, 10 valid cols, rest zero)
ROW_B0 = 384          # row 384     b_ih_l0 + b_hh_l0, cols [i|o|g|o]
ROW_B1 = 392          # row 392     b_ih_l1 + b_hh_l1, cols [i|o|g|o]
ROW_BFC = 400         # row 400     b_fc (10 valid cols, rest zero)
N_ROWS = 408          # 408 x 128 x 4B ~= 204 KB


def lstm_fc_kernel(x_ref, w_ref, out_ref):
    """One batch tile: single-timestep 2-layer LSTM cell (zero init state) + Linear head."""
    H = HIDDEN
    x = x_ref[...]                                     # (TILE_B, 128) f32, cols>=115 zero

    w0 = w_ref[ROW_W0:ROW_W0 + GATES, :]               # (128, 128)
    w1 = w_ref[ROW_W1:ROW_W1 + GATES, :]               # (128, 128), rows >= H are 0
    wfc = w_ref[ROW_WFC:ROW_WFC + GATES, :]             # (128, 128), rows >= H / cols >= 10 are 0
    b0 = w_ref[ROW_B0:ROW_B0 + 1, :]                   # (1, 128)
    b1 = w_ref[ROW_B1:ROW_B1 + 1, :]                   # (1, 128)
    bfc = w_ref[ROW_BFC:ROW_BFC + 1, :]                 # (1, 128), cols >= 10 are 0

    def lstm_cell(g):
        # g: (TILE_B, 128) gate pre-activations in slab order [i | o | g | o].
        # Full-vreg transcendentals: one sigmoid + two tanh over all 128 lanes (EUP).
        s = 0.5 * jnp.tanh(0.5 * g) + 0.5              # sigmoid of every gate
        t = jnp.tanh(g)
        # Half-vector rotation (direction-free) brings tanh(g-gate) onto lanes [0,H);
        # c_prev == 0 so the forget-gate term vanishes (f columns are not in the slab).
        c = s * pltpu.roll(t, shift=2 * H, axis=1)     # lanes [0,H) hold the cell state
        tc = jnp.tanh(c)
        # Quarter-vector rotation of s: lanes [0,H) receive slot [H,2H) or [3H,4H)
        # depending on HW roll direction; both hold sigmoid(o) (duplicated columns),
        # so h = sigmoid(o) * tanh(c) lands on lanes [0,H) either way.
        return pltpu.roll(s, shift=H, axis=1) * tc     # (TILE_B, 128); lanes >= H garbage

    # ---- layer 0 (h_prev = c_prev = 0); x cols >= 115 and w0 rows >= 115 are zero ----
    g0 = jnp.dot(x, w0, preferred_element_type=jnp.float32) + b0
    h0 = lstm_cell(g0)                                 # garbage lanes hit zero rows of w1

    # ---- layer 1 (input = h of layer 0; h_prev = c_prev = 0) ----
    g1 = jnp.dot(h0, w1, preferred_element_type=jnp.float32) + b1
    h1 = lstm_cell(g1)                                 # garbage lanes hit zero rows of wfc

    # ---- fc head: full lane-dense (TILE_B, 128) store; lanes >= 10 are exactly 0 ----
    out_ref[...] = jnp.dot(h1, wfc, preferred_element_type=jnp.float32) + bfc


def init_params(key, hidden=HIDDEN, num_classes=NUM_CLASSES):
    """Deterministic synthetic parameters (PyTorch-style uniform init)."""
    ks = jax.random.split(key, 9)
    s = 1.0 / jnp.sqrt(hidden)
    u = lambda k, shape: jax.random.uniform(k, shape, jnp.float32, -s, s)
    return dict(
        w_ih_l0=u(ks[0], (4 * hidden, INPUT_SIZE)),
        b_ih_l0=u(ks[1], (4 * hidden,)),
        b_hh_l0=u(ks[2], (4 * hidden,)),
        w_ih_l1=u(ks[3], (4 * hidden, hidden)),
        b_ih_l1=u(ks[4], (4 * hidden,)),
        b_hh_l1=u(ks[5], (4 * hidden,)),
        w_fc=u(ks[6], (num_classes, hidden)),
        b_fc=u(ks[7], (num_classes,)),
    )


def _gate_permute(m):
    """Reorder gate columns from PyTorch [i|f|g|o] to slab [i|o|g|o] (f dropped, o dup)."""
    H = HIDDEN
    i = m[..., 0 * H:1 * H]
    g = m[..., 2 * H:3 * H]
    o = m[..., 3 * H:4 * H]
    return jnp.concatenate([i, o, g, o], axis=-1)


def prepare_params(params):
    """One-time packing of all weights/biases into a single (408, 128) f32 slab.

    Call once at init and reuse for every forward; all transposes, gate reordering,
    bias fusion and zero-padding happen here, off the hot path.
    """
    w = jnp.zeros((N_ROWS, GATES), jnp.float32)
    w = w.at[ROW_W0:ROW_W0 + INPUT_SIZE, :].set(_gate_permute(params["w_ih_l0"].T))
    w = w.at[ROW_W1:ROW_W1 + HIDDEN, :].set(_gate_permute(params["w_ih_l1"].T))
    w = w.at[ROW_WFC:ROW_WFC + HIDDEN, :NUM_CLASSES].set(params["w_fc"].T)
    w = w.at[ROW_B0, :].set(_gate_permute(params["b_ih_l0"] + params["b_hh_l0"]))
    w = w.at[ROW_B1, :].set(_gate_permute(params["b_ih_l1"] + params["b_hh_l1"]))
    w = w.at[ROW_BFC, :NUM_CLASSES].set(params["b_fc"])
    return w


@jax.jit
def lstm_forward(x, packed_w):
    """x: (B, 115) f32; packed_w: output of prepare_params. Returns (B, num_classes)."""
    B = x.shape[0]
    n_pad = _round_up(max(B, 1), TILE_B)
    # One wrapper pad: fill sublanes (B -> multiple of 8) and lanes (115 -> 128).
    x_p = jnp.pad(x, ((0, n_pad - B), (0, GATES - INPUT_SIZE)))

    out = pl.pallas_call(
        lstm_fc_kernel,
        out_shape=jax.ShapeDtypeStruct((n_pad, GATES), jnp.float32),
        grid_spec=pltpu.PrefetchScalarGridSpec(
            num_scalar_prefetch=0,
            grid=(n_pad // TILE_B,),
            in_specs=[
                pl.BlockSpec((TILE_B, GATES), lambda i: (i, 0)),
                # Constant block index -> slab stays VMEM-resident, fetched once.
                pl.BlockSpec((N_ROWS, GATES), lambda i: (0, 0)),
            ],
            out_specs=pl.BlockSpec((TILE_B, GATES), lambda i: (i, 0)),
        ),
        compiler_params=pltpu.CompilerParams(dimension_semantics=("parallel",)),
    )(x_p, packed_w)
    return out[:B, :NUM_CLASSES]


def lstm_forward_ref(x, params, hidden=HIDDEN):
    """Pure-JAX reference reproducing the PyTorch forward exactly."""
    def cell(inp, w_ih, w_hh, b_ih, b_hh, h_prev, c_prev):
        g = inp @ w_ih.T + b_ih + h_prev @ w_hh.T + b_hh
        i, f, gg, o = jnp.split(g, 4, axis=-1)
        i, f, o = jax.nn.sigmoid(i), jax.nn.sigmoid(f), jax.nn.sigmoid(o)
        gg = jnp.tanh(gg)
        c = f * c_prev + i * gg
        h = o * jnp.tanh(c)
        return h, c

    B = x.shape[0]
    z = jnp.zeros((B, hidden), jnp.float32)
    zeros_hh = jnp.zeros((4 * hidden, hidden), jnp.float32)
    h1, _ = cell(x, params["w_ih_l0"], zeros_hh,
                 params["b_ih_l0"], params["b_hh_l0"], z, z)
    h2, _ = cell(h1, params["w_ih_l1"], zeros_hh,
                 params["b_ih_l1"], params["b_hh_l1"], z, z)
    return h2 @ params["w_fc"].T + params["b_fc"]


if __name__ == "__main__":
    key = jax.random.PRNGKey(0)
    kx, kp = jax.random.split(key)
    x = jax.random.normal(kx, (BATCH, INPUT_SIZE), jnp.float32)
    params = init_params(kp)

    packed_w = jax.block_until_ready(prepare_params(params))   # one-time, off hot path

    out = jax.block_until_ready(lstm_forward(x, packed_w))

    ref = lstm_forward_ref(x, params)
    assert out.shape == (BATCH, NUM_CLASSES)
    assert jnp.allclose(out, ref, atol=1e-5, rtol=1e-5), "mismatch vs reference"

    print("KERNEL_OK")
</pallas_src>

<mosaic_0001>
module attributes {stable_mosaic.version = 11 : i64} {
  func.func @lstm_fc_kernel(%arg0: i32, %arg1: memref<8x128xf32, #tpu.memory_space<vmem>>, %arg2: memref<408x128xf32, #tpu.memory_space<vmem>>, %arg3: memref<8x128xf32, #tpu.memory_space<vmem>>) attributes {dimension_semantics = [#tpu.dimension_semantics<parallel>], iteration_bounds = array<i64: 1>, scalar_prefetch = 0 : i64, scratch_operands = 0 : i64, tpu.core_type = #tpu.core_type<tc>, window_params = [{transform_indices = @transform_0, window_bounds = array<i64: 8, 128>}, {pipeline_mode = #tpu.pipeline_mode<synchronous>, transform_indices = @transform_1, window_bounds = array<i64: 408, 128>}, {transform_indices = @transform_2, window_bounds = array<i64: 8, 128>}]} {
    %c0 = arith.constant 0 : index
    %c0_0 = arith.constant 0 : index
    %0 = vector.load %arg1[%c0, %c0_0] : memref<8x128xf32, #tpu.memory_space<vmem>>, vector<8x128xf32>
    %c0_1 = arith.constant 0 : index
    %c0_2 = arith.constant 0 : index
    %1 = vector.load %arg2[%c0_1, %c0_2] : memref<408x128xf32, #tpu.memory_space<vmem>>, vector<128x128xf32>
    %c128 = arith.constant 128 : index
    %c0_3 = arith.constant 0 : index
    %2 = vector.load %arg2[%c128, %c0_3] : memref<408x128xf32, #tpu.memory_space<vmem>>, vector<128x128xf32>
    %c256 = arith.constant 256 : index
    %c0_4 = arith.constant 0 : index
    %3 = vector.load %arg2[%c256, %c0_4] : memref<408x128xf32, #tpu.memory_space<vmem>>, vector<128x128xf32>
    %c384 = arith.constant 384 : index
    %c0_5 = arith.constant 0 : index
    %4 = vector.load %arg2[%c384, %c0_5] : memref<408x128xf32, #tpu.memory_space<vmem>>, vector<1x128xf32>
    %c392 = arith.constant 392 : index
    %c0_6 = arith.constant 0 : index
    %5 = vector.load %arg2[%c392, %c0_6] : memref<408x128xf32, #tpu.memory_space<vmem>>, vector<1x128xf32>
    %c400 = arith.constant 400 : index
    %c0_7 = arith.constant 0 : index
    %6 = vector.load %arg2[%c400, %c0_7] : memref<408x128xf32, #tpu.memory_space<vmem>>, vector<1x128xf32>
    %cst = arith.constant dense<0.000000e+00> : vector<8x128xf32>
    %7 = tpu.matmul %0, %1, %cst {dimension_numbers = #tpu.dot_dimension_numbers<[1], [0], [0], [1], [0, 0, 1, 1], [], []>} : vector<8x128xf32>, vector<128x128xf32>, vector<8x128xf32> -> vector<8x128xf32>
    %8 = vector.broadcast %4 : vector<1x128xf32> to vector<8x128xf32>
    %9 = arith.addf %7, %8 : vector<8x128xf32>
    %cst_8 = arith.constant 5.000000e-01 : f32
    %10 = vector.broadcast %cst_8 : f32 to vector<8x128xf32>
    %11 = arith.mulf %10, %9 : vector<8x128xf32>
    %12 = math.tanh %11 : vector<8x128xf32>
    %cst_9 = arith.constant 5.000000e-01 : f32
    %13 = vector.broadcast %cst_9 : f32 to vector<8x128xf32>
    %14 = arith.mulf %13, %12 : vector<8x128xf32>
    %cst_10 = arith.constant 5.000000e-01 : f32
    %15 = vector.broadcast %cst_10 : f32 to vector<8x128xf32>
    %16 = arith.addf %14, %15 : vector<8x128xf32>
    %17 = math.tanh %9 : vector<8x128xf32>
    %c64_i32 = arith.constant 64 : i32
    %18 = tpu.dynamic_rotate %17 by %c64_i32 dim 1 : vector<8x128xf32>, i32 -> vector<8x128xf32>
    %19 = arith.mulf %16, %18 : vector<8x128xf32>
    %20 = math.tanh %19 : vector<8x128xf32>
    %c32_i32 = arith.constant 32 : i32
    %21 = tpu.dynamic_rotate %16 by %c32_i32 dim 1 : vector<8x128xf32>, i32 -> vector<8x128xf32>
    %22 = arith.mulf %21, %20 : vector<8x128xf32>
    %cst_11 = arith.constant dense<0.000000e+00> : vector<8x128xf32>
    %23 = tpu.matmul %22, %2, %cst_11 {dimension_numbers = #tpu.dot_dimension_numbers<[1], [0], [0], [1], [0, 0, 1, 1], [], []>} : vector<8x128xf32>, vector<128x128xf32>, vector<8x128xf32> -> vector<8x128xf32>
    %24 = vector.broadcast %5 : vector<1x128xf32> to vector<8x128xf32>
    %25 = arith.addf %23, %24 : vector<8x128xf32>
    %cst_12 = arith.constant 5.000000e-01 : f32
    %26 = vector.broadcast %cst_12 : f32 to vector<8x128xf32>
    %27 = arith.mulf %26, %25 : vector<8x128xf32>
    %28 = math.tanh %27 : vector<8x128xf32>
    %cst_13 = arith.constant 5.000000e-01 : f32
    %29 = vector.broadcast %cst_13 : f32 to vector<8x128xf32>
    %30 = arith.mulf %29, %28 : vector<8x128xf32>
    %cst_14 = arith.constant 5.000000e-01 : f32
    %31 = vector.broadcast %cst_14 : f32 to vector<8x128xf32>
    %32 = arith.addf %30, %31 : vector<8x128xf32>
    %33 = math.tanh %25 : vector<8x128xf32>
    %c64_i32_15 = arith.constant 64 : i32
    %34 = tpu.dynamic_rotate %33 by %c64_i32_15 dim 1 : vector<8x128xf32>, i32 -> vector<8x128xf32>
    %35 = arith.mulf %32, %34 : vector<8x128xf32>
    %36 = math.tanh %35 : vector<8x128xf32>
    %c32_i32_16 = arith.constant 32 : i32
    %37 = tpu.dynamic_rotate %32 by %c32_i32_16 dim 1 : vector<8x128xf32>, i32 -> vector<8x128xf32>
    %38 = arith.mulf %37, %36 : vector<8x128xf32>
    %cst_17 = arith.constant dense<0.000000e+00> : vector<8x128xf32>
    %39 = tpu.matmul %38, %3, %cst_17 {dimension_numbers = #tpu.dot_dimension_numbers<[1], [0], [0], [1], [0, 0, 1, 1], [], []>} : vector<8x128xf32>, vector<128x128xf32>, vector<8x128xf32> -> vector<8x128xf32>
    %40 = vector.broadcast %6 : vector<1x128xf32> to vector<8x128xf32>
    %41 = arith.addf %39, %40 : vector<8x128xf32>
    %c0_18 = arith.constant 0 : index
    %c0_19 = arith.constant 0 : index
    %42 = vector.load %arg3[%c0_18, %c0_19] : memref<8x128xf32, #tpu.memory_space<vmem>>, vector<8x128xf32>
    tpu.vector_store %arg3[%c0_18, %c0_19], %41 {strides = array<i32>} : memref<8x128xf32, #tpu.memory_space<vmem>>, vector<8x128xf32>,
    return
  }
  func.func @transform_0(%arg0: i32) -> (i32, i32) {
    %c0_i32 = arith.constant 0 : i32
    %c0_i32_0 = arith.constant 0 : i32
    return %arg0, %c0_i32 : i32, i32
  }
  func.func @transform_1(%arg0: i32) -> (i32, i32) {
    %c0_i32 = arith.constant 0 : i32
    %c0_i32_0 = arith.constant 0 : i32
    %c0_i32_1 = arith.constant 0 : i32
    return %c0_i32, %c0_i32_0 : i32, i32
  }
  func.func @transform_2(%arg0: i32) -> (i32, i32) {
    %c0_i32 = arith.constant 0 : i32
    %c0_i32_0 = arith.constant 0 : i32
    return %arg0, %c0_i32 : i32, i32
  }
}

</mosaic_0001>

<bundles_post_ra>
// kernel: lstm_forward.1
= control target key start
LH: loop header
LB: loop body
LE: loop exit
PB: predicated region body
PF: predicated region fallthrough
CT: control target
= control target key end

     0   :  { %7 = vsyncpa [#allocation3], 0  ;;  %s604_s9 = smov [#allocation2]   ;;  %s676_s0 = inlined_call_operand.vmem [shape: f32[8,128], index: 0, kind: input, shape index: {}]   ;;  %s677_s1 = inlined_call_operand.hbm [shape: f32[408,128], index: 1, kind: input, shape index: {}]   ;;  %s678_s2 = inlined_call_operand.vmem [shape: f32[8,128], index: 2, kind: output, shape index: {}]  }
   0x1   :  { %s15_s10 = sshll.u32 %s604_s9, 4  ;;  %s580_s13 = scalar_lea.hbm %s677_s1, 6528  ;;  %s16_s10 = int_to_ptr.vmem [resolvable:$true] %s15_s10 }
   0x2   :  { %p581_p0 = scmp.ne.s32.totalorder %s677_s1, %s580_s13  ;;  %p584_p1 = scmp.lt.u32.totalorder %s580_s13, %s677_s1 }
   0x4   :  { %p586_p2 = pnand %p584_p1, %p581_p0 }
   0x6   :  { %589 = shalt.err (!%p586_p2)
}
   0x7   :  { %s590_s18 = scalar_lea.vmem %s16_s10, 6528  ;;  %p595_p4 = scmp.lt.s32.totalorder %s16_s10, %s16_s10 }
   0x8   :  { %p591_p3 = scmp.ne.s32.totalorder %s16_s10, %s590_s18  ;;  %p596_p5 = scmp.lt.s32.totalorder %s590_s18, %s590_s18 }
   0xa   :  { %p597_p6 = por %p596_p5, %p595_p4 }
   0xc   :  { %p598_p7 = pnand %p597_p6, %p591_p3 }
   0xe   :  { %601 = shalt.err (!%p598_p7)
}
   0xf   :  { %s605_s19 = smov 128   ;;  %s606_s20 = smov 8  }
  0x10   :  { %21 = dma.hbm_to_vmem [thread:$0]  %s677_s1, 6528, %s16_s10, [#allocation3], %s605_s19, %s605_s19, %s606_s20  }
  0x11   :  { %602 = dma.done.wait [#allocation3], 6528  }
  0x12   :  { %603 = vsyncadd [#allocation3], 4294960768  ;;  %v607_v0 = vmov 0.0|0.0   ;;  %vm608_vm0 = vmmov 0   ;;  %v609_v1 = vmov 0.0   ;;  %v26_v2 = vld [vmem:[#allocation2] sm:$0xff] }
  0x13   :  { %488 = vmatprep.subr.bf16.mxu0 %v607_v0  ;;  %415 = vmatprep.mubr.msk.f32.mxu0 %vm608_vm0, %v609_v1  ;;  %v27_v3 = vld [vmem:[#allocation2 + $0x8] sm:$0xff]  ;;  %v28_v4 = vld [vmem:[#allocation2 + $0x10] sm:$0xff]  ;;  %v29_v6 = vld [vmem:[#allocation2 + $0x18] sm:$0xff]  ;;  %s611_s24 = smov 32  }
  0x14   :  { %512 = vmatprep.subr.bf16.mxu1 %v607_v0  ;;  %450 = vmatprep.mubr.msk.f32.mxu1 %vm608_vm0, %v609_v1  ;;  %v489_v5 = vpack.c.bf16 %v27_v3, %v26_v2  ;;  %v492_v7 = vpack.c.bf16 %v29_v6, %v28_v4  ;;  %v30_v8 = vld [vmem:[#allocation2 + $0x20] sm:$0xff]  ;;  %v31_v9 = vld [vmem:[#allocation2 + $0x28] sm:$0xff]  ;;  %v32_v11 = vld [vmem:[#allocation2 + $0x30] sm:$0xff] }
  0x15   :  { %v495_v10 = vpack.c.bf16 %v31_v9, %v30_v8  ;;  %v33_v12 = vld [vmem:[#allocation2 + $0x38] sm:$0xff]  ;;  %v34_v14 = vld [vmem:[#allocation2 + $0x40] sm:$0xff]  ;;  %v35_v15 = vld [vmem:[#allocation2 + $0x48] sm:$0xff] }
  0x16   :  { %490 = vmatpush3.bf16.msra.mxu0 %v489_v5  ;;  %v498_v13 = vpack.c.bf16 %v33_v12, %v32_v11  ;;  %v501_v16 = vpack.c.bf16 %v35_v15, %v34_v14  ;;  %v36_v17 = vld [vmem:[#allocation2 + $0x50] sm:$0xff]  ;;  %v37_v18 = vld [vmem:[#allocation2 + $0x58] sm:$0xff]  ;;  %v38_v20 = vld [vmem:[#allocation2 + $0x60] sm:$0xff] }
  0x17   :  { %491 = vmatprep.subr.bf16.mxu0 %v607_v0  ;;  %v504_v19 = vpack.c.bf16 %v37_v18, %v36_v17  ;;  %v39_v21 = vld [vmem:[#allocation2 + $0x68] sm:$0xff]  ;;  %v40_v23 = vld [vmem:[#allocation2 + $0x70] sm:$0xff]  ;;  %v41_v24 = vld [vmem:[#allocation2 + $0x78] sm:$0xff] }
  0x18   :  { %v507_v22 = vpack.c.bf16 %v39_v21, %v38_v20  ;;  %v510_v25 = vpack.c.bf16 %v41_v24, %v40_v23  ;;  %v25_v26 = vld [vmem:[%s676_s0] sm:$0xff]  ;;  %v43_v28 = vld [vmem:[#allocation2 + $0x88] sm:$0xff]  ;;  %v44_v29 = vld [vmem:[#allocation2 + $0x90] sm:$0xff]  ;;  %s610_s0 = smov 64  }
  0x19   :  { %v42_v27 = vld [vmem:[#allocation2 + $0x80] sm:$0xff]  ;;  %v45_v31 = vld [vmem:[#allocation2 + $0x98] sm:$0xff]  ;;  %v47_v34 = vld [vmem:[#allocation2 + $0xa8] sm:$0xff] }
  0x1a   :  { %493 = vmatpush3.bf16.msra.mxu0 %v492_v7  ;;  %v513_v30 = vpack.c.bf16 %v43_v28, %v42_v27  ;;  %v516_v32 = vpack.c.bf16 %v45_v31, %v44_v29  ;;  %v46_v33 = vld [vmem:[#allocation2 + $0xa0] sm:$0xff]  ;;  %v48_v36 = vld [vmem:[#allocation2 + $0xb0] sm:$0xff]  ;;  %v49_v37 = vld [vmem:[#allocation2 + $0xb8] sm:$0xff] }
  0x1b   :  { %494 = vmatprep.subr.bf16.mxu0 %v607_v0  ;;  %v519_v35 = vpack.c.bf16 %v47_v34, %v46_v33  ;;  %v522_v38 = vpack.c.bf16 %v49_v37, %v48_v36  ;;  %v329_v39 = vld [vmem:[#allocation2 + $0x180] ss:$0 sm:$0xff]  ;;  %v51_v41 = vld [vmem:[#allocation2 + $0xc8] sm:$0xff]  ;;  %v52_v46 = vld [vmem:[#allocation2 + $0xd0] sm:$0xff] }
  0x1c   :  { %514 = vmatpush3.bf16.msra.mxu1 %v513_v30  ;;  %v50_v40 = vld [vmem:[#allocation2 + $0xc0] sm:$0xff]  ;;  %v53_v47 = vld [vmem:[#allocation2 + $0xd8] sm:$0xff]  ;;  %v55_v51 = vld [vmem:[#allocation2 + $0xe8] sm:$0xff] }
  0x1d   :  { %515 = vmatprep.subr.bf16.mxu1 %v607_v0  ;;  %v525_v42 = vpack.c.bf16 %v51_v41, %v50_v40  ;;  %v528_v49 = vpack.c.bf16 %v53_v47, %v52_v46  ;;  %v54_v50 = vld [vmem:[#allocation2 + $0xe0] sm:$0xff]  ;;  %v56_v53 = vld [vmem:[#allocation2 + $0xf0] sm:$0xff]  ;;  %v57_v54 = vld [vmem:[#allocation2 + $0xf8] sm:$0xff] }
  0x1e   :  { %496 = vmatpush3.bf16.msra.mxu0 %v495_v10  ;;  %v531_v52 = vpack.c.bf16 %v55_v51, %v54_v50  ;;  %v534_v55 = vpack.c.bf16 %v57_v54, %v56_v53  ;;  %v58_v2 = vld [vmem:[#allocation2 + $0x100] sm:$0xff]  ;;  %v59_v3 = vld [vmem:[#allocation2 + $0x108] sm:$0xff]  ;;  %v60_v4 = vld [vmem:[#allocation2 + $0x110] sm:$0xff] }
  0x1f   :  { %497 = vmatprep.subr.bf16.mxu0 %v607_v0  ;;  %v537_v5 = vpack.c.bf16 %v59_v3, %v58_v2  ;;  %v61_v6 = vld [vmem:[#allocation2 + $0x118] sm:$0xff]  ;;  %v62_v8 = vld [vmem:[#allocation2 + $0x120] sm:$0xff]  ;;  %v63_v9 = vld [vmem:[#allocation2 + $0x128] sm:$0xff] }
  0x20   :  { %517 = vmatpush3.bf16.msra.mxu1 %v516_v32  ;;  %v540_v7 = vpack.c.bf16 %v61_v6, %v60_v4  ;;  %v543_v10 = vpack.c.bf16 %v63_v9, %v62_v8  ;;  %v64_v11 = vld [vmem:[#allocation2 + $0x130] sm:$0xff]  ;;  %v65_v12 = vld [vmem:[#allocation2 + $0x138] sm:$0xff]  ;;  %v330_v14 = vld [vmem:[#allocation2 + $0x188] ss:$0 sm:$0xff] }
  0x21   :  { %518 = vmatprep.subr.bf16.mxu1 %v607_v0  ;;  %v66_v15 = vld [vmem:[#allocation2 + $0x140] sm:$0xff]  ;;  %v68_v21 = vld [vmem:[#allocation2 + $0x150] sm:$0xff]  ;;  %v73_v29 = vld [vmem:[#allocation2 + $0x178] sm:$0xff] }
  0x22   :  { %499 = vmatpush3.bf16.msra.mxu0 %v498_v13  ;;  %v546_v13 = vpack.c.bf16 %v65_v12, %v64_v11  ;;  %v72_v28 = vld [vmem:[#allocation2 + $0x170] sm:$0xff] }
  0x23   :  { %500 = vmatprep.subr.bf16.mxu0 %v607_v0  ;;  %v558_v30 = vpack.c.bf16 %v73_v29, %v72_v28 }
  0x24   :  { %520 = vmatpush3.bf16.msra.mxu1 %v519_v35 }
  0x25   :  { %521 = vmatprep.subr.bf16.mxu1 %v607_v0 }
  0x26   :  { %502 = vmatpush3.bf16.msra.mxu0 %v501_v16  ;;  %v67_v16 = vld [vmem:[#allocation2 + $0x148] sm:$0xff] }
  0x27   :  { %503 = vmatprep.subr.bf16.mxu0 %v607_v0  ;;  %v549_v17 = vpack.c.bf16 %v67_v16, %v66_v15 }
  0x28   :  { %523 = vmatpush3.bf16.msra.mxu1 %v522_v38 }
  0x29   :  { %524 = vmatprep.subr.bf16.mxu1 %v607_v0 }
  0x2a   :  { %505 = vmatpush3.bf16.msra.mxu0 %v504_v19 }
  0x2b   :  { %506 = vmatprep.subr.bf16.mxu0 %v607_v0 }
  0x2c   :  { %526 = vmatpush3.bf16.msra.mxu1 %v525_v42 }
  0x2d   :  { %527 = vmatprep.subr.bf16.mxu1 %v607_v0 }
  0x2e   :  { %508 = vmatpush3.bf16.msra.mxu0 %v507_v22  ;;  %v69_v22 = vld [vmem:[#allocation2 + $0x158] sm:$0xff] }
  0x2f   :  { %509 = vmatprep.subr.bf16.mxu0 %v607_v0  ;;  %v552_v24 = vpack.c.bf16 %v69_v22, %v68_v21 }
  0x30   :  { %529 = vmatpush3.bf16.msra.mxu1 %v528_v49 }
  0x31   :  { %530 = vmatprep.subr.bf16.mxu1 %v607_v0 }
  0x32   :  { %511 = vmatpush3.bf16.msra.mxu0 %v510_v25  ;;  %v70_v25 = vld [vmem:[#allocation2 + $0x160] sm:$0xff] }
  0x33   :  { %536 = vmatprep.subr.bf16.mxu0 %v607_v0 }
  0x34   :  { %532 = vmatpush3.bf16.msra.mxu1 %v531_v52 }
  0x35   :  { %416 = vmatmul.mubr.f32.vlgmr.msra.gmra.mrb[0].mxu0 %v25_v26  ;;  %533 = vmatprep.subr.bf16.mxu1 %v607_v0  ;;  %v71_v26 = vld [vmem:[#allocation2 + $0x168] sm:$0xff] }
  0x36   :  { %485 = vmatprep.mubr.msk.f32.mxu0 %vm608_vm0, %v609_v1  ;;  %538 = vmatpush3.bf16.msra.mxu0 %v537_v5  ;;  %v555_v27 = vpack.c.bf16 %v71_v26, %v70_v25 }
  0x37   :  { %539 = vmatprep.subr.bf16.mxu0 %v607_v0 }
  0x38   :  { %535 = vmatpush3.bf16.msra.mxu1 %v534_v55 }
  0x3a   :  { %541 = vmatpush3.bf16.msra.mxu0 %v540_v7 }
  0x3b   :  { %542 = vmatprep.subr.bf16.mxu0 %v607_v0 }
  0x3e   :  { %544 = vmatpush3.bf16.msra.mxu0 %v543_v10 }
  0x3f   :  { %545 = vmatprep.subr.bf16.mxu0 %v607_v0 }
  0x42   :  { %547 = vmatpush3.bf16.msra.mxu0 %v546_v13 }
  0x43   :  { %548 = vmatprep.subr.bf16.mxu0 %v607_v0 }
  0x46   :  { %550 = vmatpush3.bf16.msra.mxu0 %v549_v17 }
  0x47   :  { %551 = vmatprep.subr.bf16.mxu0 %v607_v0 }
  0x4a   :  { %553 = vmatpush3.bf16.msra.mxu0 %v552_v24 }
  0x4b   :  { %554 = vmatprep.subr.bf16.mxu0 %v607_v0 }
  0x4e   :  { %556 = vmatpush3.bf16.msra.mxu0 %v555_v27 }
  0x4f   :  { %557 = vmatprep.subr.bf16.mxu0 %v607_v0  ;;  %v331_v0 = vld [vmem:[#allocation2 + $0x190] ss:$0 sm:$0xff] }
  0x52   :  { %559 = vmatpush3.bf16.msra.mxu0 %v558_v30 }
 0x108   :  { %v147_v43 = vpop.f32.mrb[0].mxu0 }
 0x109   :  { %v148_v44 = vadd.f32 %v329_v39, %v147_v43  ;;  %v417_v45 = vpop.f32.mrb[1].mxu0 }
 0x10b   :  { %v151_v48 = vmul.f32 0.5, %v148_v44  ;;  %568 = vtanh.f32 %v148_v44 }
 0x10d   :  { %570 = vtanh.f32 %v151_v48 }
 0x115   :  { %v569_v56 = vpop.eup %568 }
 0x116   :  { %156 = vrot.lane.b32.xlu0 %v569_v56, %s610_s0 }
 0x117   :  { %v571_v57 = vpop.eup %570 }
 0x118   :  { %v153_v58 = vmul.f32 0.5, %v571_v57 }
 0x11a   :  { %v154_v59 = vadd.f32 0.5, %v153_v58 }
 0x11c   :  { %160 = vrot.lane.b32.xlu0 %v154_v59, %s611_s24 }
 0x188   :  { %v157_v60 = vpop.permute.xlu0 %156 }
 0x189   :  { %v158_v61 = vmul.f32 %v157_v60, %v154_v59 }
 0x18b   :  { %572 = vtanh.f32 %v158_v61 }
 0x18e   :  { %v161_v63 = vpop.permute.xlu0 %160 }
 0x195   :  { %v573_v62 = vpop.eup %572 }
 0x196   :  { %v162_v1 = vmul.f32 %v573_v62, %v161_v63 }
 0x198   :  { %451 = vmatmul.mubr.f32.vlgmr.msra.gmra.mrb[0].mxu1 %v162_v1 }
 0x26b   :  { %v233_v18 = vpop.f32.mrb[0].mxu1 }
 0x26c   :  { %v234_v19 = vadd.f32 %v330_v14, %v233_v18  ;;  %v452_v20 = vpop.f32.mrb[1].mxu1 }
 0x26e   :  { %v237_v23 = vmul.f32 0.5, %v234_v19  ;;  %574 = vtanh.f32 %v234_v19 }
 0x270   :  { %576 = vtanh.f32 %v237_v23 }
 0x278   :  { %v575_v31 = vpop.eup %574 }
 0x279   :  { %242 = vrot.lane.b32.xlu1 %v575_v31, %s610_s0 }
 0x27a   :  { %v577_v32 = vpop.eup %576 }
 0x27b   :  { %v239_v33 = vmul.f32 0.5, %v577_v32 }
 0x27d   :  { %v240_v34 = vadd.f32 0.5, %v239_v33 }
 0x27f   :  { %246 = vrot.lane.b32.xlu1 %v240_v34, %s611_s24 }
 0x2eb   :  { %v243_v35 = vpop.permute.xlu1 %242 }
 0x2ec   :  { %v244_v36 = vmul.f32 %v243_v35, %v240_v34 }
 0x2ee   :  { %578 = vtanh.f32 %v244_v36 }
 0x2f1   :  { %v247_v38 = vpop.permute.xlu1 %246 }
 0x2f8   :  { %v579_v37 = vpop.eup %578 }
 0x2f9   :  { %v248_v39 = vmul.f32 %v579_v37, %v247_v38 }
 0x2fb   :  { %486 = vmatmul.mubr.f32.vlgmr.msra.gmra.mrb[2].mxu0 %v248_v39 }
 0x3ce   :  { %v319_v40 = vpop.f32.mrb[2].mxu0 }
 0x3cf   :  { %v320_v41 = vadd.f32 %v331_v0, %v319_v40  ;;  %v487_v42 = vpop.f32.mrb[3].mxu0 }
 0x3d1   :  { %323 = vst [vmem:[%s678_s2] sm:$0xff] %v320_v41 }
 0x3d2   :  { %328 = vsyncpa [#allocation3], 1 }

</bundles_post_ra>
